<compile_context>
chip_gen: v5e
topology: v5e:2x2
jax: 0.10.0
libtpu: 0.0.40
codegen_flags: <defaults>
</compile_context>

<pallas_src>
import functools
import math

import jax
import jax.numpy as jnp
from jax.experimental import pallas as pl
from jax.experimental.pallas import tpu as pltpu

ALPHA = 0.2          # LeakyReLU negative slope
NEG_BIG = -1e30      # f32-safe mask value (exp underflows cleanly to 0)
LANE = 128


def _round_up(x, m):
    return (x + m - 1) // m * m


# ---------------------------------------------------------------------------
# Pass 1: per-row-tile projection.
#   Wh = x @ W  (bf16 operands, f32 accumulation; stored bf16)
#   f1 = sum(Wh * a1, -1),  f2 = sum(Wh * a2, -1)   (f32)
# ---------------------------------------------------------------------------
def _proj_kernel(x_ref, w_ref, a1_ref, a2_ref, wh_ref, f1_ref, f2_ref):
    wh = jnp.dot(x_ref[...].astype(jnp.bfloat16),
                 w_ref[...].astype(jnp.bfloat16),
                 preferred_element_type=jnp.float32)              # (TI, Fp) f32
    wh_ref[...] = wh.astype(wh_ref.dtype)
    f1_ref[...] = jnp.sum(wh * a1_ref[...], axis=-1, keepdims=True)
    f2_ref[...] = jnp.sum(wh * a2_ref[...], axis=-1, keepdims=True)


# ---------------------------------------------------------------------------
# Pass 2: tiled attention aggregation with online (flash-style) normalization.
#   logit[i,j] = -LeakyReLU(f1[i] + f2[j]); masked where adj == 0
#   out[i]     = (sum_j exp(logit) * Wh[j]) / (sum_j exp(logit))
# The running-max shift is mathematically identical to torch's exp/rowsum.
# ---------------------------------------------------------------------------
def _attention_kernel(f1_ref, f2_ref, adj_ref, wh_ref, o_ref,
                      m_sc, l_sc, acc_sc, *, alpha, apply_elu):
    j = pl.program_id(1)

    @pl.when(j == 0)
    def _init():
        m_sc[...] = jnp.full_like(m_sc, NEG_BIG)
        l_sc[...] = jnp.zeros_like(l_sc)
        acc_sc[...] = jnp.zeros_like(acc_sc)

    f1 = f1_ref[...]                              # (TI, 1)  f32
    f2 = f2_ref[...]                              # (1, TJ)  f32, lane-dense
    s = f1 + f2                                   # VPU broadcast-add (TI, TJ)
    logit = -jnp.where(s > 0.0, s, alpha * s)     # -LeakyReLU(s)
    mask = adj_ref[...] != 0                      # int8 structure, no f32 cast
    logit = jnp.where(mask, logit, NEG_BIG)

    m_prev = m_sc[...]
    m_new = jnp.maximum(m_prev, jnp.max(logit, axis=1, keepdims=True))
    rescale = jnp.exp(m_prev - m_new)
    p = jnp.where(mask, jnp.exp(logit - m_new), 0.0)          # (TI, TJ) f32
    l_sc[...] = rescale * l_sc[...] + jnp.sum(p, axis=1, keepdims=True)
    acc_sc[...] = rescale * acc_sc[...] + jnp.dot(
        p.astype(jnp.bfloat16), wh_ref[...],                  # bf16 MXU, f32 acc
        preferred_element_type=jnp.float32)
    m_sc[...] = m_new

    @pl.when(j == pl.num_programs(1) - 1)
    def _finalize():
        l = jnp.maximum(l_sc[...], 1e-30)          # guard padded/isolated rows
        hp = acc_sc[...] * pl.reciprocal(l, approx=True)   # one vrcp per row
        if apply_elu:
            # ELU; exp argument clamped so the discarded branch never infs.
            hp = jnp.where(hp > 0.0, hp, jnp.exp(jnp.minimum(hp, 0.0)) - 1.0)
        o_ref[...] = hp.astype(o_ref.dtype)


# ---------------------------------------------------------------------------
# One SpGraphAttentionLayer forward (eval mode).
# ---------------------------------------------------------------------------
def sp_gat_layer(x, adj_mask, W, a, *, alpha=ALPHA, apply_elu,
                 tile_i=256, tile_j=512, vmem_limit_bytes=32 * 1024 * 1024):
    """x: (N, Fin) f32, adj_mask: (N_pad, N_pad) int8, W: (Fin, Fout),
    a: (1, 2*Fout).  Returns (N, Fout) f32."""
    N, Fin = x.shape
    Fout = W.shape[1]
    N_pad = adj_mask.shape[0]

    # Lane-dense feature padding: Fout -> multiple of 128 so both matmuls and
    # the output store run full-lane (unmasked vst).
    F_pad = _round_up(max(Fout, LANE), LANE)
    W_p = jnp.zeros((Fin, F_pad), jnp.float32).at[:, :Fout].set(
        W.astype(jnp.float32))
    a1 = jnp.zeros((1, F_pad), jnp.float32).at[:, :Fout].set(
        a[:, :Fout].astype(jnp.float32))
    a2 = jnp.zeros((1, F_pad), jnp.float32).at[:, :Fout].set(
        a[:, Fout:].astype(jnp.float32))

    x_p = x.astype(jnp.float32)
    if N_pad != N:
        x_p = jnp.zeros((N_pad, Fin), jnp.float32).at[:N, :].set(x_p)

    # Tile sizes: divisors of N_pad (N_pad is a multiple of 128, so gcd keeps
    # sublane/lane alignment).  Per-generation tuning knob.
    ti = math.gcd(min(tile_i, N_pad), N_pad)
    tj = math.gcd(min(tile_j, N_pad), N_pad)

    cparams_1d = pltpu.CompilerParams(
        dimension_semantics=("parallel",), vmem_limit_bytes=vmem_limit_bytes)
    cparams_2d = pltpu.CompilerParams(
        dimension_semantics=("parallel", "arbitrary"),
        vmem_limit_bytes=vmem_limit_bytes)

    # ---- pass 1: Wh, f1, f2 computed once -------------------------------
    wh, f1, f2col = pl.pallas_call(
        _proj_kernel,
        out_shape=(
            jax.ShapeDtypeStruct((N_pad, F_pad), jnp.bfloat16),
            jax.ShapeDtypeStruct((N_pad, 1), jnp.float32),
            jax.ShapeDtypeStruct((N_pad, 1), jnp.float32),
        ),
        grid=(N_pad // ti,),
        in_specs=[
            pl.BlockSpec((ti, Fin), lambda i: (i, 0)),
            pl.BlockSpec((Fin, F_pad), lambda i: (0, 0)),
            pl.BlockSpec((1, F_pad), lambda i: (0, 0)),
            pl.BlockSpec((1, F_pad), lambda i: (0, 0)),
        ],
        out_specs=(
            pl.BlockSpec((ti, F_pad), lambda i: (i, 0)),
            pl.BlockSpec((ti, 1), lambda i: (i, 0)),
            pl.BlockSpec((ti, 1), lambda i: (i, 0)),
        ),
        compiler_params=cparams_1d,
    )(x_p, W_p, a1, a2)

    # Single tiny transpose OUTSIDE the inner loop: f2 becomes a lane-major
    # (1, N) row, so each attention tile only does a VPU broadcast-add.
    f2row = f2col.T

    # ---- pass 2: online-softmax attention aggregation -------------------
    out_p = pl.pallas_call(
        functools.partial(_attention_kernel, alpha=alpha, apply_elu=apply_elu),
        out_shape=jax.ShapeDtypeStruct((N_pad, F_pad), jnp.float32),
        grid=(N_pad // ti, N_pad // tj),
        in_specs=[
            pl.BlockSpec((ti, 1), lambda i, j: (i, 0)),       # f1 (rows)
            pl.BlockSpec((1, tj), lambda i, j: (0, j)),       # f2 (keys, lane)
            pl.BlockSpec((ti, tj), lambda i, j: (i, j)),      # adj int8 tile
            pl.BlockSpec((tj, F_pad), lambda i, j: (j, 0)),   # Wh values (bf16)
        ],
        out_specs=pl.BlockSpec((ti, F_pad), lambda i, j: (i, 0)),
        scratch_shapes=[
            pltpu.VMEM((ti, 1), jnp.float32),       # running max
            pltpu.VMEM((ti, 1), jnp.float32),       # running sum
            pltpu.VMEM((ti, F_pad), jnp.float32),   # accumulator
        ],
        compiler_params=cparams_2d,
    )(f1, f2row, adj_mask, wh)

    return out_p[:N, :Fout]


# ---------------------------------------------------------------------------
# Full SpGAT forward (eval mode).
# ---------------------------------------------------------------------------
def spgat_forward(x, adj, head_params, out_params, *, alpha=ALPHA,
                  tile_i=256, tile_j=512):
    """head_params: list of (W, a) for the concat=True heads;
    out_params: (W, a) for the concat=False output layer."""
    N = x.shape[0]
    N_pad = _round_up(max(N, LANE), LANE)
    # Only the adjacency *structure* matters (adj.nonzero in the reference);
    # int8 keeps the dominant (N,N) HBM stream 4x smaller than f32.
    adj_mask = jnp.zeros((N_pad, N_pad), jnp.int8).at[:N, :N].set(
        (adj != 0).astype(jnp.int8))

    # TODO(synk): F.dropout on the input and on edge_e is skipped — eval-mode
    # (training=False) semantics only.
    heads = [
        sp_gat_layer(x, adj_mask, W, a, alpha=alpha, apply_elu=True,
                     tile_i=tile_i, tile_j=tile_j)
        for (W, a) in head_params
    ]
    h = jnp.concatenate(heads, axis=1)
    W_o, a_o = out_params
    return sp_gat_layer(h, adj_mask, W_o, a_o, alpha=alpha, apply_elu=False,
                        tile_i=tile_i, tile_j=tile_j)


# ---------------------------------------------------------------------------
# Pure-JAX reference (mirrors the kernel's dtype policy: bf16 matmul operands,
# f32 accumulation, f32 everywhere else) for correctness checking.
# ---------------------------------------------------------------------------
def _layer_ref(x, adj, W, a, *, alpha, apply_elu):
    Fout = W.shape[1]
    wh = jnp.dot(x.astype(jnp.bfloat16), W.astype(jnp.bfloat16),
                 preferred_element_type=jnp.float32)
    a1 = a[:, :Fout].astype(jnp.float32)
    a2 = a[:, Fout:].astype(jnp.float32)
    f1 = jnp.sum(wh * a1, axis=1, keepdims=True)
    f2 = jnp.sum(wh * a2, axis=1, keepdims=True)
    s = f1 + f2.T
    logit = -jnp.where(s > 0, s, alpha * s)                 # -LeakyReLU
    e = jnp.where(adj != 0, jnp.exp(logit), 0.0)            # edge_e (dense view)
    den = jnp.sum(e, axis=1, keepdims=True)                 # e_rowsum
    num = jnp.dot(e.astype(jnp.bfloat16), wh.astype(jnp.bfloat16),
                  preferred_element_type=jnp.float32)
    hp = num / den
    if apply_elu:
        hp = jnp.where(hp > 0, hp, jnp.expm1(jnp.minimum(hp, 0.0)))
    return hp


def spgat_reference(x, adj, head_params, out_params, *, alpha=ALPHA):
    heads = [_layer_ref(x, adj, W, a, alpha=alpha, apply_elu=True)
             for (W, a) in head_params]
    h = jnp.concatenate(heads, axis=1)
    W_o, a_o = out_params
    return _layer_ref(h, adj, W_o, a_o, alpha=alpha, apply_elu=False)


if __name__ == "__main__":
    # Small SpGAT: 200 nodes, nfeat=64, nhid=32, nclass=16, 3 heads.
    N, nfeat, nhid, nclass, nheads = 200, 64, 32, 16, 3

    key = jax.random.PRNGKey(0)
    keys = jax.random.split(key, 2 * nheads + 4)

    def xavier_normal(k, shape, gain=1.414):
        std = gain * math.sqrt(2.0 / (shape[0] + shape[1]))
        return std * jax.random.normal(k, shape, jnp.float32)

    head_params = []
    for hidx in range(nheads):
        Wh_ = xavier_normal(keys[2 * hidx], (nfeat, nhid))
        ah_ = xavier_normal(keys[2 * hidx + 1], (1, 2 * nhid))
        head_params.append((Wh_, ah_))
    W_o = xavier_normal(keys[2 * nheads], (nhid * nheads, nclass))
    a_o = xavier_normal(keys[2 * nheads + 1], (1, 2 * nclass))

    x = jax.random.normal(keys[-2], (N, nfeat), jnp.float32)
    adj = (jax.random.uniform(keys[-1], (N, N)) > 0.9).astype(jnp.float32)
    adj = jnp.maximum(adj, adj.T)                               # symmetric
    adj = jnp.maximum(adj, jnp.eye(N, dtype=jnp.float32))       # self-loops

    # Small tiles so the 2-D grid / online-softmax path is exercised
    # (N is padded to 256 -> 2x2 attention grid per layer).
    out = spgat_forward(x, adj, head_params, (W_o, a_o),
                        tile_i=128, tile_j=128)
    out = jax.block_until_ready(out)

    ref = spgat_reference(x, adj, head_params, (W_o, a_o))
    assert out.shape == (N, nclass)
    assert not bool(jnp.isnan(out).any())
    # Tolerance sized for bf16 matmul operands across two stacked layers.
    assert jnp.allclose(out, ref, atol=5e-2, rtol=5e-2), \
        float(jnp.max(jnp.abs(out - ref)))

    print("KERNEL_OK")
</pallas_src>

<mosaic_0001>
module attributes {stable_mosaic.version = 11 : i64} {
  func.func @_proj_kernel(%arg0: i32, %arg1: memref<128x64xf32, #tpu.memory_space<vmem>>, %arg2: memref<64x128xf32, #tpu.memory_space<vmem>>, %arg3: memref<1x128xf32, #tpu.memory_space<vmem>>, %arg4: memref<1x128xf32, #tpu.memory_space<vmem>>, %arg5: memref<128x128xbf16, #tpu.memory_space<vmem>>, %arg6: memref<128x1xf32, #tpu.memory_space<vmem>>, %arg7: memref<128x1xf32, #tpu.memory_space<vmem>>) attributes {dimension_semantics = [#tpu.dimension_semantics<parallel>], iteration_bounds = array<i64: 2>, scalar_prefetch = 0 : i64, scratch_operands = 0 : i64, tpu.core_type = #tpu.core_type<tc>, window_params = [{transform_indices = @transform_0, window_bounds = array<i64: 128, 64>}, {pipeline_mode = #tpu.pipeline_mode<synchronous>, transform_indices = @transform_1, window_bounds = array<i64: 64, 128>}, {pipeline_mode = #tpu.pipeline_mode<synchronous>, transform_indices = @transform_2, window_bounds = array<i64: 1, 128>}, {pipeline_mode = #tpu.pipeline_mode<synchronous>, transform_indices = @transform_3, window_bounds = array<i64: 1, 128>}, {transform_indices = @transform_4, window_bounds = array<i64: 128, 128>}, {transform_indices = @transform_5, window_bounds = array<i64: 128, 1>}, {transform_indices = @transform_6, window_bounds = array<i64: 128, 1>}]} {
    %c0 = arith.constant 0 : index
    %c0_0 = arith.constant 0 : index
    %0 = vector.load %arg1[%c0, %c0_0] : memref<128x64xf32, #tpu.memory_space<vmem>>, vector<128x64xf32>
    %1 = arith.truncf %0 : vector<128x64xf32> to vector<128x64xbf16>
    %c0_1 = arith.constant 0 : index
    %c0_2 = arith.constant 0 : index
    %2 = vector.load %arg2[%c0_1, %c0_2] : memref<64x128xf32, #tpu.memory_space<vmem>>, vector<64x128xf32>
    %3 = arith.truncf %2 : vector<64x128xf32> to vector<64x128xbf16>
    %cst = arith.constant dense<0.000000e+00> : vector<128x128xf32>
    %4 = tpu.matmul %1, %3, %cst {dimension_numbers = #tpu.dot_dimension_numbers<[1], [0], [0], [1], [0, 0, 1, 1], [], []>} : vector<128x64xbf16>, vector<64x128xbf16>, vector<128x128xf32> -> vector<128x128xf32>
    %5 = arith.truncf %4 : vector<128x128xf32> to vector<128x128xbf16>
    %c0_3 = arith.constant 0 : index
    %c0_4 = arith.constant 0 : index
    %6 = vector.load %arg5[%c0_3, %c0_4] : memref<128x128xbf16, #tpu.memory_space<vmem>>, vector<128x128xbf16>
    tpu.vector_store %arg5[%c0_3, %c0_4], %5 {strides = array<i32>} : memref<128x128xbf16, #tpu.memory_space<vmem>>, vector<128x128xbf16>,
    %c0_5 = arith.constant 0 : index
    %c0_6 = arith.constant 0 : index
    %7 = vector.load %arg3[%c0_5, %c0_6] : memref<1x128xf32, #tpu.memory_space<vmem>>, vector<1x128xf32>
    %8 = vector.broadcast %7 : vector<1x128xf32> to vector<128x128xf32>
    %9 = arith.mulf %4, %8 : vector<128x128xf32>
    %cst_7 = arith.constant dense<0.000000e+00> : vector<128xf32>
    %10 = vector.multi_reduction <add>, %9, %cst_7 [1] : vector<128x128xf32> to vector<128xf32>
    %11 = vector.shape_cast %10 : vector<128xf32> to vector<128x1xf32>
    %c0_8 = arith.constant 0 : index
    %c0_9 = arith.constant 0 : index
    %12 = vector.load %arg6[%c0_8, %c0_9] : memref<128x1xf32, #tpu.memory_space<vmem>>, vector<128x1xf32>
    tpu.vector_store %arg6[%c0_8, %c0_9], %11 {strides = array<i32>} : memref<128x1xf32, #tpu.memory_space<vmem>>, vector<128x1xf32>,
    %c0_10 = arith.constant 0 : index
    %c0_11 = arith.constant 0 : index
    %13 = vector.load %arg4[%c0_10, %c0_11] : memref<1x128xf32, #tpu.memory_space<vmem>>, vector<1x128xf32>
    %14 = vector.broadcast %13 : vector<1x128xf32> to vector<128x128xf32>
    %15 = arith.mulf %4, %14 : vector<128x128xf32>
    %cst_12 = arith.constant dense<0.000000e+00> : vector<128xf32>
    %16 = vector.multi_reduction <add>, %15, %cst_12 [1] : vector<128x128xf32> to vector<128xf32>
    %17 = vector.shape_cast %16 : vector<128xf32> to vector<128x1xf32>
    %c0_13 = arith.constant 0 : index
    %c0_14 = arith.constant 0 : index
    %18 = vector.load %arg7[%c0_13, %c0_14] : memref<128x1xf32, #tpu.memory_space<vmem>>, vector<128x1xf32>
    tpu.vector_store %arg7[%c0_13, %c0_14], %17 {strides = array<i32>} : memref<128x1xf32, #tpu.memory_space<vmem>>, vector<128x1xf32>,
    return
  }
  func.func @transform_0(%arg0: i32) -> (i32, i32) {
    %c0_i32 = arith.constant 0 : i32
    %c0_i32_0 = arith.constant 0 : i32
    return %arg0, %c0_i32 : i32, i32
  }
  func.func @transform_1(%arg0: i32) -> (i32, i32) {
    %c0_i32 = arith.constant 0 : i32
    %c0_i32_0 = arith.constant 0 : i32
    %c0_i32_1 = arith.constant 0 : i32
    return %c0_i32, %c0_i32_0 : i32, i32
  }
  func.func @transform_2(%arg0: i32) -> (i32, i32) {
    %c0_i32 = arith.constant 0 : i32
    %c0_i32_0 = arith.constant 0 : i32
    %c0_i32_1 = arith.constant 0 : i32
    return %c0_i32, %c0_i32_0 : i32, i32
  }
  func.func @transform_3(%arg0: i32) -> (i32, i32) {
    %c0_i32 = arith.constant 0 : i32
    %c0_i32_0 = arith.constant 0 : i32
    %c0_i32_1 = arith.constant 0 : i32
    return %c0_i32, %c0_i32_0 : i32, i32
  }
  func.func @transform_4(%arg0: i32) -> (i32, i32) {
    %c0_i32 = arith.constant 0 : i32
    %c0_i32_0 = arith.constant 0 : i32
    return %arg0, %c0_i32 : i32, i32
  }
  func.func @transform_5(%arg0: i32) -> (i32, i32) {
    %c0_i32 = arith.constant 0 : i32
    %c0_i32_0 = arith.constant 0 : i32
    return %arg0, %c0_i32 : i32, i32
  }
  func.func @transform_6(%arg0: i32) -> (i32, i32) {
    %c0_i32 = arith.constant 0 : i32
    %c0_i32_0 = arith.constant 0 : i32
    return %arg0, %c0_i32 : i32, i32
  }
}

</mosaic_0001>

<bundles_post_ra>
// kernel: tpu_custom_call.1
= control target key start
LH: loop header
LB: loop body
LE: loop exit
PB: predicated region body
PF: predicated region fallthrough
CT: control target
= control target key end

     0   :  { %12 = vsyncpa [#allocation3], 0  ;;  %s1214_s0 = inlined_call_operand.vmem [shape: f32[256,64], index: 0, kind: input, shape index: {}]   ;;  %s1215_s1 = inlined_call_operand.vmem [shape: f32[64,128], index: 1, kind: input, shape index: {}]   ;;  %s1216_s2 = inlined_call_operand.vmem [shape: f32[1,128], index: 2, kind: input, shape index: {}]   ;;  %s1217_s3 = inlined_call_operand.vmem [shape: f32[1,128], index: 3, kind: input, shape index: {}]   ;;  %s1218_s4 = inlined_call_operand.hbm [shape: bf16[256,128], index: 4, kind: output, shape index: {0}]   ;;  %s1219_s5 = inlined_call_operand.vmem [shape: f32[256,1], index: 5, kind: output, shape index: {1}]   ;;  %s1220_s6 = inlined_call_operand.vmem [shape: f32[256,1], index: 6, kind: output, shape index: {2}]  }
   0x1   :  { %14 = vsyncpa [#allocation3 + $0x1], 0  ;;  %s934_s21 = smov 0   ;;  %s936_s22 = smov 0  }
   0x2   :  { %s938_s23 = smov 0   ;;  %s940_s24 = smov 0  }
   0x3 LB: > { %s955_s25 = sadd.s32 4294967295, %s895_s24   ;;  %s706_s26 = sadd.s32 4294967294, %s895_s24   ;;  %s895_s24 = sphi %s940_s24, %s1226_s24   ;;  %s891_s23 = sphi %s938_s23, %s1225_s23   ;;  %s887_s22 = sphi %s936_s22, %s1224_s22   ;;  %s883_s21 = sphi %s934_s21, %s1223_s21  }
   0x4   : > { %s959_s27 = sadd.s32 1, %s895_s24   ;;  %s116_s28 = sadd.s32 1, %s891_s23 }
   0x5   : > { %s113_s29 = ssub.s32 %s895_s24, %s959_s27  ;;  %p126_p0 = scmp.ne.s32.totalorder %s891_s23, %s887_s22 }
   0x6   : > { %p114_p1 = scmp.eq.s32.totalorder %s113_s29, 0  ;;  %p127_p2 = scmp.eq.s32.totalorder %s955_s25, 1 }
   0x7   : > { %p132_p3 = scmp.ne.s32.totalorder %s887_s22, %s883_s21  ;;  %p133_p4 = scmp.eq.s32.totalorder %s706_s26, 1 }
   0x8   : > { %s970_s30 = scalar_select %p114_p1, %s891_s23, %s116_s28  }
   0x9   : > { %p972_p5 = por %p127_p2, %p126_p0  ;;  %p976_p6 = por %p133_p4, %p132_p3 }
   0xa   : > { %p709_p7 = scmp.ge.s32.totalorder %s895_s24, 1  ;;  %p221_p8 = scmp.lt.s32.totalorder %s895_s24, 3 }
   0xc   : > { %p222_p9 = pnand %p709_p7, %p221_p8 }
   0xd   : > { %s711_s15 = sshll.u32 (!%p222_p9), %s955_s25, 4  ;;  %s244_s19 = sand.u32 (!%p222_p9), 1, %s887_s22  }
   0xe   : > { %225 = sbr.rel (%p222_p9) target bundleno = 364 (0x16c), region = 36  ;;  %p262_p10 = scmp.lt.s32.totalorder (!%p222_p9), %s711_s15, 31 }
   0xf   : > { %s710_s20 = sshll.u32 (!%p222_p9), %s244_s19, 6  ;;  %s730_s29 = sshll.u32 (!%p222_p9), %s955_s25, 6 }
  0x10   : > { %s1058_s26 = scalar_lea.vmem (!%p222_p9), [#allocation2], %s710_s20  ;;  %s582_s11 = scalar_lea.hbm (!%p222_p9), %s1218_s4, %s730_s29 }
  0x11   : > { %s583_s12 = sshll.u32 (!%p222_p9), %s1058_s26, 4  ;;  %s585_s13 = sshll.u32 (!%p222_p9), %s582_s11, 4  ;;  %s584_s12 = int_to_ptr.vmem [resolvable:$true] %s583_s12  ;;  %s586_s13 = int_to_ptr.hbm [resolvable:$true] %s585_s13 }
  0x12   : > { %s561_s25 = scalar_lea.sflag (!%p222_p9), [#allocation3], %s244_s19  ;;  %s847_s14 = sshra.s32 (!%p222_p9), %s586_s13, 4  ;;  %s848_s14 = int_to_ptr.hbm [resolvable:$true] %s847_s14 }
  0x13   : > { %v311_v0 = vld [vmem:[%s1215_s1 + $0x30] sm:$0xff]  ;;  %v312_v1 = vld [vmem:[%s1215_s1 + $0x38] sm:$0xff]  ;;  %v309_v2 = vld [vmem:[%s1215_s1 + $0x20] sm:$0xff]  ;;  %s1228_s15 = smov (!%p262_p10, %s711_s15), 31  ;;  %vm317_vm0 = vcmask 523264   ;;  %s853_s18 = scalar_lea.hbm %s1218_s4, 128 }
  0x14   : > { %v316_v3 = vpack.c.bf16 %v312_v1, %v311_v0  ;;  %v310_v4 = vld [vmem:[%s1215_s1 + $0x28] sm:$0xff]  ;;  %v307_v6 = vld [vmem:[%s1215_s1 + $0x10] sm:$0xff]  ;;  %v308_v7 = vld [vmem:[%s1215_s1 + $0x18] sm:$0xff]  ;;  %s1001_s28 = sshll.u32 %s1228_s15, 3  ;;  %s849_s15 = scalar_lea.hbm %s848_s14, 64 }
  0x15   : > { %v315_v5 = vpack.c.bf16 %v310_v4, %v309_v2  ;;  %v314_v8 = vpack.c.bf16 %v308_v7, %v307_v6  ;;  %s1007_s10 = scalar_lea.vmem %s1214_s0, %s1001_s28  ;;  %v305_v9 = vld [vmem:[%s1215_s1] sm:$0xff]  ;;  %v306_v10 = vld [vmem:[%s1215_s1 + $0x8] sm:$0xff]  ;;  %p850_p11 = scmp.ne.s32.totalorder %s848_s14, %s849_s15 }
  0x16   : > { %346 = vmatpush.bf16.msra.mxu0 %v316_v3  ;;  %778 = vmatpush.bf16.msra.mxu1 %v316_v3  ;;  %v281_v11 = vld [vmem:[%s1007_s10] sm:$0xff]  ;;  %v282_v12 = vld [vmem:[%s1007_s10 + $0x8] sm:$0xff]  ;;  %v313_v13 = vpack.c.bf16 %v306_v10, %v305_v9  ;;  %v283_v24 = vld [vmem:[%s1007_s10 + $0x10] sm:$0xff]  ;;  %p854_p0 = scmp.lt.s32.totalorder %s848_s14, %s1218_s4  ;;  %p855_p1 = scmp.lt.s32.totalorder %s853_s18, %s849_s15 }
  0x17   : > { %780 = vmatpush.bf16.msra.mxu3 %v316_v3  ;;  %779 = vmatpush.bf16.msra.mxu2 %v316_v3  ;;  %v285_v14 = vld [vmem:[%s1007_s10 + $0x20] sm:$0xff]  ;;  %v286_v15 = vld [vmem:[%s1007_s10 + $0x28] sm:$0xff]  ;;  %v297_v20 = vpack.c.bf16 %v282_v12, %v281_v11  ;;  %v284_v25 = vld [vmem:[%s1007_s10 + $0x18] sm:$0xff]  ;;  %p851_p12 = pnand %p850_p11, %p972_p5 }
  0x18   : > { %v293_v16 = vld [vmem:[%s1007_s10 + $0x60] sm:$0xff]  ;;  %v294_v17 = vld [vmem:[%s1007_s10 + $0x68] sm:$0xff]  ;;  %v299_v21 = vpack.c.bf16 %v286_v15, %v285_v14  ;;  %v287_v26 = vld [vmem:[%s1007_s10 + $0x30] sm:$0xff]  ;;  %v298_v32 = vpack.c.bf16 %v284_v25, %v283_v24  ;;  %p856_p2 = por %p855_p1, %p854_p0 }
  0x19   : > { %v289_v18 = vld [vmem:[%s1007_s10 + $0x40] sm:$0xff]  ;;  %v290_v19 = vld [vmem:[%s1007_s10 + $0x48] sm:$0xff]  ;;  %v303_v22 = vpack.c.bf16 %v294_v17, %v293_v16  ;;  %v288_v27 = vld [vmem:[%s1007_s10 + $0x38] sm:$0xff]  ;;  %p852_p13 = pneg %p851_p12 }
  0x1a   : > { %347 = vmatpush.bf16.msra.mxu0 %v315_v5  ;;  %781 = vmatpush.bf16.msra.mxu1 %v315_v5  ;;  %v301_v23 = vpack.c.bf16 %v290_v19, %v289_v18  ;;  %v291_v28 = vld [vmem:[%s1007_s10 + $0x50] sm:$0xff]  ;;  %v292_v29 = vld [vmem:[%s1007_s10 + $0x58] sm:$0xff]  ;;  %v300_v33 = vpack.c.bf16 %v288_v27, %v287_v26  ;;  %v1042_v36 = vld [vmem:[%s1216_s2] ss:$0 sm:$0xff] }
  0x1b   : > { %783 = vmatpush.bf16.msra.mxu3 %v315_v5  ;;  %782 = vmatpush.bf16.msra.mxu2 %v315_v5  ;;  %v295_v30 = vld [vmem:[%s1007_s10 + $0x70] sm:$0xff]  ;;  %v296_v31 = vld [vmem:[%s1007_s10 + $0x78] sm:$0xff]  ;;  %v302_v34 = vpack.c.bf16 %v292_v29, %v291_v28  ;;  %v1047_v37 = vld [vmem:[%s1217_s3] ss:$0 sm:$0xff]  ;;  %p857_p3 = pnand %p856_p2, %p852_p13 }
  0x1c   : > { %v304_v35 = vpack.c.bf16 %v296_v31, %v295_v30 }
  0x1e   : > { %348 = vmatpush.bf16.msra.mxu0 %v314_v8  ;;  %784 = vmatpush.bf16.msra.mxu1 %v314_v8 }
  0x1f   : > { %786 = vmatpush.bf16.msra.mxu3 %v314_v8  ;;  %785 = vmatpush.bf16.msra.mxu2 %v314_v8 }
  0x22   : > { %349 = vmatpush.bf16.msra.mxu0 %v313_v13  ;;  %787 = vmatpush.bf16.msra.mxu1 %v313_v13 }
  0x23   : > { %789 = vmatpush.bf16.msra.mxu3 %v313_v13  ;;  %788 = vmatpush.bf16.msra.mxu2 %v313_v13 }
  0x25   : > { %717 = vmatmul.msk.bf16.vlgmr.msra.gmra.mxu0 %vm317_vm0, %v297_v20  ;;  %719 = vmatmul.msk.bf16.vlgmr.msra.gmra.mxu1 %vm317_vm0, %v299_v21 }
  0x26   : > { %723 = vmatmul.msk.bf16.vlgmr.msra.gmra.mxu3 %vm317_vm0, %v303_v22  ;;  %721 = vmatmul.msk.bf16.vlgmr.msra.gmra.mxu2 %vm317_vm0, %v301_v23 }
  0x35   : > { %718 = vmatmul.msk.bf16.gmra.mxu0 %vm317_vm0, %v298_v32  ;;  %720 = vmatmul.msk.bf16.gmra.mxu1 %vm317_vm0, %v300_v33 }
  0x36   : > { %722 = vmatmul.msk.bf16.gmra.mxu2 %vm317_vm0, %v302_v34  ;;  %724 = vmatmul.msk.bf16.gmra.mxu3 %vm317_vm0, %v304_v35 }
  0xa2   : > { %v351_v38 = vpop.f32.mrf.mxu0  ;;  %v361_v39 = vpop.f32.mrf.mxu1 }
  0xa3   : > { %v431_v40 = vmul.f32 %v1042_v36, %v361_v39  ;;  %v496_v41 = vmul.f32 %v1047_v37, %v351_v38  ;;  %v427_v42 = vmul.f32 %v1042_v36, %v351_v38  ;;  %v500_v45 = vmul.f32 %v1047_v37, %v361_v39 }
  0xa5   : > { %451 = vadd.xlane.f32.xlu2 %v431_v40  ;;  %512 = vadd.xlane.f32.xlu1 %v496_v41 }
  0xa6   : > { %443 = vadd.xlane.f32.xlu0 %v427_v42 }
  0xa9   : > { %v381_v43 = vpop.f32.mrf.mxu3  ;;  %v371_v44 = vpop.f32.mrf.mxu2 }
  0xaa   : > { %v353_v46 = vpop.f32.mrf.mxu0  ;;  %v363_v47 = vpop.f32.mrf.mxu1  ;;  %v508_v48 = vmul.f32 %v1047_v37, %v381_v43  ;;  %v439_v49 = vmul.f32 %v1042_v36, %v381_v43  ;;  %v435_v54 = vmul.f32 %v1042_v36, %v371_v44  ;;  %v504_v57 = vmul.f32 %v1047_v37, %v371_v44 }
  0xab   : > { %v734_v50 = vpack.c.bf16 %v353_v46, %v351_v38  ;;  %v744_v51 = vpack.c.bf16 %v363_v47, %v361_v39  ;;  %v432_v1 = vmul.f32 %v1042_v36, %v363_v47  ;;  %v428_v5 = vmul.f32 %v1042_v36, %v353_v46 }
  0xac   : > { %v497_v11 = vmul.f32 %v1047_v37, %v353_v46  ;;  %v501_v12 = vmul.f32 %v1047_v37, %v363_v47 }
  0xad   : > { %735 = vst [vmem:[%s1058_s26] sm:$0xff] %v734_v50   ;;  %520 = vadd.xlane.f32.xlu2 %v500_v45  ;;  %536 = vadd.xlane.f32.xlu1 %v508_v48 }
  0xae   : > { %772 = vst [vmem:[%s1058_s26 + $0x10] sm:$0xff] %v744_v51   ;;  %467 = vadd.xlane.f32.xlu0 %v439_v49 }
  0xb1   : > { %v1062_v52 = vpop.f32.mrf.mxu3  ;;  %v373_v53 = vpop.f32.mrf.mxu2 }
  0xb2   : > { %v764_v55 = vpack.c.bf16 %v1062_v52, %v381_v43  ;;  %v754_v56 = vpack.c.bf16 %v373_v53, %v371_v44  ;;  %v356_v58 = vpop.f32.mrf.mxu0  ;;  %v366_v59 = vpop.f32.mrf.mxu1  ;;  %v440_v60 = vmul.f32 %v1042_v36, %v1062_v52  ;;  %v505_v2 = vmul.f32 %v1047_v37, %v373_v53 }
  0xb3   : > { %v429_v6 = vmul.f32 %v1042_v36, %v356_v58  ;;  %v502_v14 = vmul.f32 %v1047_v37, %v366_v59  ;;  %v436_v15 = vmul.f32 %v1042_v36, %v373_v53  ;;  %v433_v18 = vmul.f32 %v1042_v36, %v366_v59 }
  0xb4   : > { %776 = vst [vmem:[%s1058_s26 + $0x30] sm:$0xff] %v764_v55   ;;  %v498_v21 = vmul.f32 %v1047_v37, %v356_v58  ;;  %v509_v25 = vmul.f32 %v1047_v37, %v1062_v52 }
  0xb5   : > { %774 = vst [vmem:[%s1058_s26 + $0x20] sm:$0xff] %v754_v56   ;;  %459 = vadd.xlane.f32.xlu2 %v435_v54  ;;  %469 = vadd.xlane.f32.xlu1 %v440_v60 }
  0xb6   : > { %528 = vadd.xlane.f32.xlu0 %v504_v57 }
  0xb9   : > { %v376_v61 = vpop.f32.mrf.mxu2  ;;  %v1071_v62 = vpop.f32.mrf.mxu3 }
  0xba   : > { %v358_v63 = vpop.f32.mrf.mxu0  ;;  %v368_v0 = vpop.f32.mrf.mxu1  ;;  %v441_v13 = vmul.f32 %v1042_v36, %v1071_v62  ;;  %v506_v16 = vmul.f32 %v1047_v37, %v376_v61  ;;  %v437_v17 = vmul.f32 %v1042_v36, %v376_v61 }
  0xbb   : > { %v739_v3 = vpack.c.bf16 %v358_v63, %v356_v58  ;;  %v749_v4 = vpack.c.bf16 %v368_v0, %v366_v59  ;;  %v503_v19 = vmul.f32 %v1047_v37, %v368_v0  ;;  %v430_v20 = vmul.f32 %v1042_v36, %v358_v63 }
  0xbc   : > { %v434_v23 = vmul.f32 %v1042_v36, %v368_v0  ;;  %v499_v26 = vmul.f32 %v1047_v37, %v358_v63 }
  0xbd   : > { %453 = vadd.xlane.f32.xlu2 %v432_v1  ;;  %530 = vadd.xlane.f32.xlu1 %v505_v2  ;;  %771 = vst [vmem:[%s1058_s26 + $0x8] sm:$0xff] %v739_v3  }
  0xbe   : > { %445 = vadd.xlane.f32.xlu0 %v428_v5  ;;  %773 = vst [vmem:[%s1058_s26 + $0x18] sm:$0xff] %v749_v4  }
  0xc1   : > { %v378_v7 = vpop.f32.mrf.mxu2  ;;  %v388_v8 = vpop.f32.mrf.mxu3 }
  0xc2   : > { %v759_v9 = vpack.c.bf16 %v378_v7, %v376_v61  ;;  %v769_v10 = vpack.c.bf16 %v388_v8, %v1071_v62  ;;  %v438_v22 = vmul.f32 %v1042_v36, %v378_v7  ;;  %v442_v24 = vmul.f32 %v1042_v36, %v388_v8 }
  0xc3   : > { %v507_v27 = vmul.f32 %v1047_v37, %v378_v7 }
  0xc4   : > { %775 = vst [vmem:[%s1058_s26 + $0x28] sm:$0xff] %v759_v9  }
  0xc5   : > { %514 = vadd.xlane.f32.xlu2 %v497_v11  ;;  %447 = vadd.xlane.f32.xlu1 %v429_v6  ;;  %777 = vst [vmem:[%s1058_s26 + $0x38] sm:$0xff] %v769_v10  }
  0xc6   : > { %522 = vadd.xlane.f32.xlu0 %v501_v12 }
  0xcd   : > { %471 = vadd.xlane.f32.xlu2 %v441_v13  ;;  %524 = vadd.xlane.f32.xlu1 %v502_v14 }
  0xce   : > { %461 = vadd.xlane.f32.xlu0 %v436_v15 }
  0xd5   : > { %532 = vadd.xlane.f32.xlu2 %v506_v16  ;;  %463 = vadd.xlane.f32.xlu1 %v437_v17 }
  0xd6   : > { %455 = vadd.xlane.f32.xlu0 %v433_v18 }
  0xdd   : > { %526 = vadd.xlane.f32.xlu2 %v503_v19  ;;  %449 = vadd.xlane.f32.xlu1 %v430_v20 }
  0xde   : > { %516 = vadd.xlane.f32.xlu0 %v498_v21 }
  0xe5   : > { %465 = vadd.xlane.f32.xlu2 %v438_v22  ;;  %457 = vadd.xlane.f32.xlu1 %v434_v23 }
  0xe6   : > { %473 = vadd.xlane.f32.xlu0 %v442_v24 }
  0xed   : > { %538 = vadd.xlane.f32.xlu2 %v509_v25  ;;  %518 = vadd.xlane.f32.xlu1 %v499_v26 }
  0xee   : > { %860 = shalt.err (!%p857_p3)
}
  0xef   : > { %s897_s19 = smov 64   ;;  %s898_s29 = smov 4   ;;  %534 = vadd.xlane.f32.xlu0 %v507_v27  ;;  %v511_v28 = vmul.f32 %v1047_v37, %v388_v8  ;;  %v510_v29 = vmul.f32 %v1047_v37, %v1071_v62  ;;  %vm475_vm1 = vcmask 7168  }
  0xf0   : > { %790 = dma.vmem_to_hbm [thread:$0]  (%p972_p5), %s584_s12, 1024, %s586_s13, %s561_s25, %s897_s19, %s897_s19, %s898_s29  }
  0xf1   : > { %s1125_s11 = scalar_lea.vmem %s1220_s6, %s1001_s28  ;;  %s1131_s7 = scalar_lea.vmem %s1219_s5, %s1001_s28 }
  0xf5   : > { %542 = vadd.xlane.f32.xlu1 %v511_v28 }
  0xf7   : > { %540 = vadd.xlane.f32.xlu0 %v510_v29 }
 0x118   : > { %v452_v30 = vpop.xlane.xlu2 %451  ;;  %v513_v31 = vpop.xlane.xlu1 %512 }
 0x119   : > { %480 = vst.msk [vmem:[%s1131_s7 + $0x20] sm:$0xff] %vm475_vm1, %v452_v30  ;;  %v444_v32 = vpop.xlane.xlu0 %443 }
 0x11a   : > { %544 = vst.msk [vmem:[%s1125_s11] sm:$0xff] %vm475_vm1, %v513_v31 }
 0x11b   : > { %476 = vst.msk [vmem:[%s1131_s7] sm:$0xff] %vm475_vm1, %v444_v32 }
 0x120   : > { %v521_v33 = vpop.xlane.xlu2 %520  ;;  %v537_v34 = vpop.xlane.xlu1 %536 }
 0x121   : > { %548 = vst.msk [vmem:[%s1125_s11 + $0x20] sm:$0xff] %vm475_vm1, %v521_v33  ;;  %v468_v35 = vpop.xlane.xlu0 %467 }
 0x122   : > { %556 = vst.msk [vmem:[%s1125_s11 + $0x60] sm:$0xff] %vm475_vm1, %v537_v34 }
 0x123   : > { %488 = vst.msk [vmem:[%s1131_s7 + $0x60] sm:$0xff] %vm475_vm1, %v468_v35 }
 0x128   : > { %v460_v36 = vpop.xlane.xlu2 %459  ;;  %v470_v37 = vpop.xlane.xlu1 %469 }
 0x129   : > { %484 = vst.msk [vmem:[%s1131_s7 + $0x40] sm:$0xff] %vm475_vm1, %v460_v36  ;;  %v529_v38 = vpop.xlane.xlu0 %528 }
 0x12a   : > { %489 = vst.msk [vmem:[%s1131_s7 + $0x68] sm:$0xff] %vm475_vm1, %v470_v37 }
 0x12b   : > { %552 = vst.msk [vmem:[%s1125_s11 + $0x40] sm:$0xff] %vm475_vm1, %v529_v38 }
 0x130   : > { %v454_v39 = vpop.xlane.xlu2 %453  ;;  %v531_v40 = vpop.xlane.xlu1 %530 }
 0x131   : > { %481 = vst.msk [vmem:[%s1131_s7 + $0x28] sm:$0xff] %vm475_vm1, %v454_v39  ;;  %v446_v41 = vpop.xlane.xlu0 %445 }
 0x132   : > { %553 = vst.msk [vmem:[%s1125_s11 + $0x48] sm:$0xff] %vm475_vm1, %v531_v40 }
 0x133   : > { %477 = vst.msk [vmem:[%s1131_s7 + $0x8] sm:$0xff] %vm475_vm1, %v446_v41 }
 0x138   : > { %v515_v42 = vpop.xlane.xlu2 %514  ;;  %v448_v43 = vpop.xlane.xlu1 %447 }
 0x139   : > { %545 = vst.msk [vmem:[%s1125_s11 + $0x8] sm:$0xff] %vm475_vm1, %v515_v42  ;;  %v523_v44 = vpop.xlane.xlu0 %522 }
 0x13a   : > { %549 = vst.msk [vmem:[%s1125_s11 + $0x28] sm:$0xff] %vm475_vm1, %v523_v44 }
 0x13b   : > { %478 = vst.msk [vmem:[%s1131_s7 + $0x10] sm:$0xff] %vm475_vm1, %v448_v43 }
 0x140   : > { %v472_v45 = vpop.xlane.xlu2 %471  ;;  %v525_v46 = vpop.xlane.xlu1 %524 }
 0x141   : > { %490 = vst.msk [vmem:[%s1131_s7 + $0x70] sm:$0xff] %vm475_vm1, %v472_v45  ;;  %v462_v47 = vpop.xlane.xlu0 %461 }
 0x142   : > { %485 = vst.msk [vmem:[%s1131_s7 + $0x48] sm:$0xff] %vm475_vm1, %v462_v47 }
 0x143   : > { %550 = vst.msk [vmem:[%s1125_s11 + $0x30] sm:$0xff] %vm475_vm1, %v525_v46 }
 0x148   : > { %v533_v48 = vpop.xlane.xlu2 %532  ;;  %v464_v49 = vpop.xlane.xlu1 %463 }
 0x149   : > { %554 = vst.msk [vmem:[%s1125_s11 + $0x50] sm:$0xff] %vm475_vm1, %v533_v48  ;;  %v456_v50 = vpop.xlane.xlu0 %455 }
 0x14a   : > { %482 = vst.msk [vmem:[%s1131_s7 + $0x30] sm:$0xff] %vm475_vm1, %v456_v50 }
 0x14b   : > { %486 = vst.msk [vmem:[%s1131_s7 + $0x50] sm:$0xff] %vm475_vm1, %v464_v49 }
 0x150   : > { %v527_v51 = vpop.xlane.xlu2 %526  ;;  %v450_v52 = vpop.xlane.xlu1 %449 }
 0x151   : > { %551 = vst.msk [vmem:[%s1125_s11 + $0x38] sm:$0xff] %vm475_vm1, %v527_v51  ;;  %v517_v53 = vpop.xlane.xlu0 %516 }
 0x152   : > { %546 = vst.msk [vmem:[%s1125_s11 + $0x10] sm:$0xff] %vm475_vm1, %v517_v53 }
 0x153   : > { %479 = vst.msk [vmem:[%s1131_s7 + $0x18] sm:$0xff] %vm475_vm1, %v450_v52 }
 0x158   : > { %v466_v54 = vpop.xlane.xlu2 %465  ;;  %v458_v55 = vpop.xlane.xlu1 %457 }
 0x159   : > { %487 = vst.msk [vmem:[%s1131_s7 + $0x58] sm:$0xff] %vm475_vm1, %v466_v54  ;;  %v474_v56 = vpop.xlane.xlu0 %473 }
 0x15a   : > { %491 = vst.msk [vmem:[%s1131_s7 + $0x78] sm:$0xff] %vm475_vm1, %v474_v56 }
 0x15b   : > { %483 = vst.msk [vmem:[%s1131_s7 + $0x38] sm:$0xff] %vm475_vm1, %v458_v55 }
 0x160   : > { %v539_v57 = vpop.xlane.xlu2 %538  ;;  %v519_v58 = vpop.xlane.xlu1 %518 }
 0x161   : > { %557 = vst.msk [vmem:[%s1125_s11 + $0x68] sm:$0xff] %vm475_vm1, %v539_v57 }
 0x162   : > { %v535_v59 = vpop.xlane.xlu0 %534  ;;  %547 = vst.msk [vmem:[%s1125_s11 + $0x18] sm:$0xff] %vm475_vm1, %v519_v58 }
 0x163   : > { %555 = vst.msk [vmem:[%s1125_s11 + $0x58] sm:$0xff] %vm475_vm1, %v535_v59 }
 0x168   : > { %v543_v60 = vpop.xlane.xlu1 %542 }
 0x169   : > { %559 = vst.msk [vmem:[%s1125_s11 + $0x78] sm:$0xff] %vm475_vm1, %v543_v60 }
 0x16a   : > { %v541_v61 = vpop.xlane.xlu0 %540 }
 0x16b   : > { %558 = vst.msk [vmem:[%s1125_s11 + $0x70] sm:$0xff] %vm475_vm1, %v541_v61 }
 0x16c PF: > { %p796_p4 = scmp.ge.s32.totalorder %s895_s24, 2  ;;  %s608_s28 = sand.u32 1, %s883_s21  }
 0x16d   : > { %s609_s12 = scalar_lea.sflag [#allocation3], %s608_s28 }
 0x16e   : > { %p793_p5 = pnand %p796_p4, %p976_p6 }
 0x170   : > { %p794_p7 = pneg %p793_p5 }
 0x172   : > { %878 = dma.done.wait (%p794_p7), %s609_s12, 1024  }
 0x173   : > { %880 = vsyncadd (%p794_p7), %s609_s12, 4294966272  ;;  %p17_p8 = scmp.ge.s32.totalorder %s959_s27, 4   ;;  %s1223_s21 = smov %s887_s22 }
 0x174   : > { %s1224_s22 = smov %s891_s23  ;;  %s1225_s23 = smov %s970_s30 }
 0x175   : > { %s1226_s24 = smov %s959_s27  ;;  %19 = sbr.rel (!%p17_p8) target bundleno = 3 (0x3), region = 95 }
 0x17a   :  { %631 = vsyncpa [#allocation3], 1 }
 0x17b   :  { %633 = vsyncpa [#allocation3 + $0x1], 1 }

</bundles_post_ra>
